<compile_context>
chip_gen: v7x
topology: tpu7x:2x2x1
jax: 0.10.0
libtpu: 0.0.40
codegen_flags: <defaults>
</compile_context>

<pallas_src>
import functools

import jax
import jax.numpy as jnp
from jax import lax
from jax.experimental import pallas as pl
from jax.experimental.pallas import tpu as pltpu

USE_CLAMP = True                      # repo-global `use_clamp` flag
_INV_SQRT2 = 0.7071067811865476


def _entropy_kernel(half_q, use_clamp, complementary, approx_recip,
                    bounds_ref, *refs):
    """Elementwise: clamp -> gaussian-mixture interval likelihood -> bits."""
    if complementary:
        x_ref, m1_ref, m2_ref, s1_ref, s2_ref, p1_ref = refs[:-1]
        p2_ref = None
    else:
        x_ref, m1_ref, m2_ref, s1_ref, s2_ref, p1_ref, p2_ref = refs[:-1]
    bits_ref = refs[-1]

    x = x_ref[...].astype(jnp.float32)
    if use_clamp:
        x = jnp.clip(x, bounds_ref[0], bounds_ref[1])

    # Hoisted reciprocal with 1/sqrt(2) folded in: 2 divides/elem instead of 4.
    s1 = jnp.maximum(s1_ref[...].astype(jnp.float32), 1e-9)
    s2 = jnp.maximum(s2_ref[...].astype(jnp.float32), 1e-9)
    if approx_recip:                       # v7x lever: route divide to the EUP
        k1 = _INV_SQRT2 * pl.reciprocal(s1, approx=True)
        k2 = _INV_SQRT2 * pl.reciprocal(s2, approx=True)
    else:
        k1 = _INV_SQRT2 / s1
        k2 = _INV_SQRT2 / s2

    # Shared-offset erf arguments: d_i +/- h_i.
    d1 = (x - m1_ref[...].astype(jnp.float32)) * k1
    d2 = (x - m2_ref[...].astype(jnp.float32)) * k2
    h1 = half_q * k1
    h2 = half_q * k2

    # cdf(hi) - cdf(lo) == 0.5 * (erf(a_hi) - erf(a_lo)); erf is monotone and
    # h_i > 0 (Q > 0), so the difference is non-negative -> abs() dropped.
    # The 0.5 is folded into the mixture combine below.
    de1 = lax.erf(d1 + h1) - lax.erf(d1 - h1)
    de2 = lax.erf(d2 + h2) - lax.erf(d2 - h2)

    p1 = p1_ref[...].astype(jnp.float32)
    if complementary:
        p2 = 1.0 - p1                      # caller guarantees p1 + p2 == 1
    else:
        p2 = p2_ref[...].astype(jnp.float32)

    lkl = 0.5 * (p1 * de1 + p2 * de2)
    lkl = jnp.maximum(lkl, 1e-6)           # Low_bound (applied twice; idempotent)
    bits_ref[...] = -jnp.log2(lkl)


def entropy_gaussian_mix_prob_2(x, mean1, mean2, scale1, scale2, probs1,
                                probs2=None, Q=1.0, x_mean=None, *,
                                tile_rows=512, max_lanes=512,
                                approx_recip=False,
                                vmem_limit_bytes=32 * 1024 * 1024):
    """JAX wrapper around the Pallas kernel. All tensor operands share one shape.

    probs2=None means the caller guarantees probs1 + probs2 == 1; the second
    probability stream is then dropped (one fewer HBM input) and recomputed
    in-kernel.  Pass a precomputed x_mean to avoid an extra HBM pass over x.
    """
    assert Q > 0, "abs() was folded away assuming Q > 0"
    assert tile_rows % 8 == 0 and max_lanes % 128 == 0

    complementary = probs2 is None
    orig_shape = x.shape
    total = x.size

    # Lane-dense layout without padding whenever possible: pick the largest
    # lane width (<= max_lanes, multiple of 128) that divides total exactly so
    # no jnp.pad copy of the operands and no output slice is needed.
    lanes = None
    for cand in sorted({max_lanes, 512, 256, 128}, reverse=True):
        if cand <= max_lanes and cand <= total and total % cand == 0:
            lanes = cand
            break
    if lanes is None:
        lanes = 128                        # rare fallback: pad to a lane multiple
        padded = -(-total // lanes) * lanes
    else:
        padded = total
    pad = padded - total
    rows = padded // lanes

    # Row tiling: ~1 MiB f32 blocks per stream by default to amortize per-step
    # overhead, capped near rows/2 so the "parallel" grid has >= 2 steps for
    # v7x's two TensorCores whenever the input is large enough.
    if rows > 8:
        half = max(8, ((rows // 2 + 7) // 8) * 8)
        tile_rows_eff = min(tile_rows, half)
    else:
        tile_rows_eff = rows               # block == full sublane extent
    n_blocks = pl.cdiv(rows, tile_rows_eff)

    def prep(a, fill):
        a = jnp.asarray(a).reshape(-1)     # keep native dtype (bf16 stays bf16)
        if pad:
            a = jnp.pad(a, (0, pad), constant_values=fill)
        return a.reshape(rows, lanes)

    # Scalar clamp bounds: detached full reduction -> plain JAX.  Prefer a
    # precomputed x_mean; the fallback costs one extra HBM read of x because
    # the pallas_call boundary prevents fusing the reduction.
    if USE_CLAMP:
        if x_mean is None:
            x_mean = jnp.mean(jnp.asarray(x, jnp.float32))
        x_mean = jnp.asarray(x_mean, jnp.float32)
        bounds = jnp.stack([x_mean - 15000.0 * Q, x_mean + 15000.0 * Q])
    else:
        bounds = jnp.zeros((2,), jnp.float32)
    bounds = bounds.astype(jnp.float32)    # (2,) scalars -> SMEM

    ins = [prep(x, 0.0), prep(mean1, 0.0), prep(mean2, 0.0),
           prep(scale1, 1.0), prep(scale2, 1.0), prep(probs1, 0.5)]
    if not complementary:
        ins.append(prep(probs2, 0.5))

    tile_spec = pl.BlockSpec((tile_rows_eff, lanes), lambda i: (i, 0))
    kernel = functools.partial(_entropy_kernel, float(0.5 * Q), USE_CLAMP,
                               complementary, approx_recip)

    out = pl.pallas_call(
        kernel,
        out_shape=jax.ShapeDtypeStruct((rows, lanes), jnp.float32),
        grid_spec=pltpu.PrefetchScalarGridSpec(
            num_scalar_prefetch=0,
            grid=(n_blocks,),
            in_specs=[pl.BlockSpec(memory_space=pltpu.MemorySpace.SMEM)]  # bounds
                     + [tile_spec] * len(ins),
            out_specs=tile_spec,
        ),
        compiler_params=pltpu.CompilerParams(
            dimension_semantics=("parallel",),
            vmem_limit_bytes=vmem_limit_bytes),
    )(bounds, *ins)

    if pad:
        return out.reshape(-1)[:total].reshape(orig_shape)
    return out.reshape(orig_shape)


def _reference(x, mean1, mean2, scale1, scale2, probs1, probs2, Q=1.0):
    """Pure-JAX mirror of the PyTorch forward (literal formulation)."""
    if USE_CLAMP:
        x_mean = jnp.mean(x)
        x = jnp.clip(x, x_mean - 15000.0 * Q, x_mean + 15000.0 * Q)
    s1 = jnp.maximum(scale1, 1e-9)
    s2 = jnp.maximum(scale2, 1e-9)

    def cdf(v, m, s):
        return 0.5 * (1.0 + lax.erf((v - m) / (s * jnp.sqrt(2.0))))

    l1 = jnp.abs(cdf(x + 0.5 * Q, mean1, s1) - cdf(x - 0.5 * Q, mean1, s1))
    l2 = jnp.abs(cdf(x + 0.5 * Q, mean2, s2) - cdf(x - 0.5 * Q, mean2, s2))
    lkl = jnp.maximum(probs1 * l1 + probs2 * l2, 1e-6)
    return -jnp.log2(lkl)


def _check(bits, ref_bits, name):
    assert bits.shape == ref_bits.shape and bits.dtype == jnp.float32
    lk = jnp.exp2(-bits)
    lr = jnp.exp2(-ref_bits)
    # Interval likelihoods must agree to well within f32 cancellation noise.
    err_l = float(jnp.max(jnp.abs(lk - lr)))
    # Bits must agree tightly wherever the likelihood is well conditioned
    # (-log2 amplifies unavoidable f32 tail-cancellation noise otherwise).
    well = lr > 1e-2
    err_b = float(jnp.max(jnp.where(well, jnp.abs(bits - ref_bits), 0.0)))
    assert err_l < 1e-5, f"{name}: likelihood mismatch {err_l}"
    assert err_b < 1e-3, f"{name}: bits mismatch {err_b}"


def _make_inputs(key, shape):
    ks = jax.random.split(key, 6)
    x = jax.random.normal(ks[0], shape, jnp.float32) * 2.0
    mean1 = jax.random.normal(ks[1], shape, jnp.float32)
    mean2 = jax.random.normal(ks[2], shape, jnp.float32)
    scale1 = jax.nn.softplus(jax.random.normal(ks[3], shape, jnp.float32))
    scale2 = jax.nn.softplus(jax.random.normal(ks[4], shape, jnp.float32))
    logits = jax.random.normal(ks[5], shape + (2,), jnp.float32)
    p = jax.nn.softmax(logits, axis=-1)
    return x, mean1, mean2, scale1, scale2, p[..., 0], p[..., 1]


if __name__ == "__main__":
    key = jax.random.PRNGKey(0)
    k1, k2, k3, k4 = jax.random.split(key, 4)

    # (a) Module-like small shape; explicit probs2; precomputed x_mean
    #     (optimized path: no extra HBM pass for the mean). Single-block grid.
    args_a = _make_inputs(k1, (2, 4, 16, 16))
    xm_a = jnp.mean(args_a[0])
    bits_a = jax.block_until_ready(
        entropy_gaussian_mix_prob_2(*args_a, Q=1.0, x_mean=xm_a))
    _check(bits_a, _reference(*args_a, Q=1.0), "small")

    # (b) Larger shape; complementary-probs path (probs2 dropped -> 7 streams);
    #     multi-step grid; x_mean fallback exercised.
    args_b = _make_inputs(k2, (2, 4, 64, 64))
    bits_b = jax.block_until_ready(
        entropy_gaussian_mix_prob_2(*args_b[:6], probs2=None, Q=1.0))
    _check(bits_b, _reference(*args_b, Q=1.0), "complementary/grid")

    # (c) Element count divisible by 256 but not 512 and rows not divisible by
    #     the row tile -> lanes=256, masked partial boundary block, no padding.
    args_c = _make_inputs(k3, (3, 5, 16, 16))
    bits_c = jax.block_until_ready(entropy_gaussian_mix_prob_2(*args_c, Q=1.0))
    _check(bits_c, _reference(*args_c, Q=1.0), "boundary")

    # (d) Element count not a multiple of 128 -> rare pad fallback path.
    args_d = _make_inputs(k4, (2, 3, 5, 7))
    bits_d = jax.block_until_ready(entropy_gaussian_mix_prob_2(*args_d, Q=1.0))
    _check(bits_d, _reference(*args_d, Q=1.0), "pad-fallback")

    print("KERNEL_OK")
</pallas_src>

<mosaic_0001>
module attributes {stable_mosaic.version = 11 : i64} {
  func.func @_entropy_kernel(%arg0: i32, %arg1: memref<2xf32, #tpu.memory_space<smem>>, %arg2: memref<4x512xf32, #tpu.memory_space<vmem>>, %arg3: memref<4x512xf32, #tpu.memory_space<vmem>>, %arg4: memref<4x512xf32, #tpu.memory_space<vmem>>, %arg5: memref<4x512xf32, #tpu.memory_space<vmem>>, %arg6: memref<4x512xf32, #tpu.memory_space<vmem>>, %arg7: memref<4x512xf32, #tpu.memory_space<vmem>>, %arg8: memref<4x512xf32, #tpu.memory_space<vmem>>, %arg9: memref<4x512xf32, #tpu.memory_space<vmem>>) attributes {dimension_semantics = [#tpu.dimension_semantics<parallel>], iteration_bounds = array<i64: 1>, scalar_prefetch = 0 : i64, scratch_operands = 0 : i64, tpu.core_type = #tpu.core_type<tc>, window_params = [{transform_indices = @transform_0, window_bounds = array<i64: 2>}, {transform_indices = @transform_1, window_bounds = array<i64: 4, 512>}, {transform_indices = @transform_2, window_bounds = array<i64: 4, 512>}, {transform_indices = @transform_3, window_bounds = array<i64: 4, 512>}, {transform_indices = @transform_4, window_bounds = array<i64: 4, 512>}, {transform_indices = @transform_5, window_bounds = array<i64: 4, 512>}, {transform_indices = @transform_6, window_bounds = array<i64: 4, 512>}, {transform_indices = @transform_7, window_bounds = array<i64: 4, 512>}, {transform_indices = @transform_8, window_bounds = array<i64: 4, 512>}]} {
    %c0 = arith.constant 0 : index
    %c0_0 = arith.constant 0 : index
    %0 = vector.load %arg2[%c0, %c0_0] : memref<4x512xf32, #tpu.memory_space<vmem>>, vector<4x512xf32>
    %c0_1 = arith.constant 0 : index
    %1 = memref.load %arg1[%c0_1] : memref<2xf32, #tpu.memory_space<smem>>
    %c1 = arith.constant 1 : index
    %2 = memref.load %arg1[%c1] : memref<2xf32, #tpu.memory_space<smem>>
    %3 = vector.broadcast %1 : f32 to vector<4x512xf32>
    %4 = arith.maximumf %3, %0 : vector<4x512xf32>
    %5 = vector.broadcast %2 : f32 to vector<4x512xf32>
    %6 = arith.minimumf %5, %4 : vector<4x512xf32>
    %c0_2 = arith.constant 0 : index
    %c0_3 = arith.constant 0 : index
    %7 = vector.load %arg5[%c0_2, %c0_3] : memref<4x512xf32, #tpu.memory_space<vmem>>, vector<4x512xf32>
    %cst = arith.constant 9.99999971E-10 : f32
    %8 = vector.broadcast %cst : f32 to vector<4x512xf32>
    %9 = arith.maximumf %7, %8 : vector<4x512xf32>
    %c0_4 = arith.constant 0 : index
    %c0_5 = arith.constant 0 : index
    %10 = vector.load %arg6[%c0_4, %c0_5] : memref<4x512xf32, #tpu.memory_space<vmem>>, vector<4x512xf32>
    %cst_6 = arith.constant 9.99999971E-10 : f32
    %11 = vector.broadcast %cst_6 : f32 to vector<4x512xf32>
    %12 = arith.maximumf %10, %11 : vector<4x512xf32>
    %cst_7 = arith.constant 0.707106769 : f32
    %13 = vector.broadcast %cst_7 : f32 to vector<4x512xf32>
    %14 = arith.divf %13, %9 : vector<4x512xf32>
    %cst_8 = arith.constant 0.707106769 : f32
    %15 = vector.broadcast %cst_8 : f32 to vector<4x512xf32>
    %16 = arith.divf %15, %12 : vector<4x512xf32>
    %c0_9 = arith.constant 0 : index
    %c0_10 = arith.constant 0 : index
    %17 = vector.load %arg3[%c0_9, %c0_10] : memref<4x512xf32, #tpu.memory_space<vmem>>, vector<4x512xf32>
    %18 = arith.subf %6, %17 : vector<4x512xf32>
    %19 = arith.mulf %18, %14 : vector<4x512xf32>
    %c0_11 = arith.constant 0 : index
    %c0_12 = arith.constant 0 : index
    %20 = vector.load %arg4[%c0_11, %c0_12] : memref<4x512xf32, #tpu.memory_space<vmem>>, vector<4x512xf32>
    %21 = arith.subf %6, %20 : vector<4x512xf32>
    %22 = arith.mulf %21, %16 : vector<4x512xf32>
    %cst_13 = arith.constant 5.000000e-01 : f32
    %23 = vector.broadcast %cst_13 : f32 to vector<4x512xf32>
    %24 = arith.mulf %23, %14 : vector<4x512xf32>
    %cst_14 = arith.constant 5.000000e-01 : f32
    %25 = vector.broadcast %cst_14 : f32 to vector<4x512xf32>
    %26 = arith.mulf %25, %16 : vector<4x512xf32>
    %27 = arith.addf %19, %24 : vector<4x512xf32>
    %28 = math.erf %27 : vector<4x512xf32>
    %29 = arith.subf %19, %24 : vector<4x512xf32>
    %30 = math.erf %29 : vector<4x512xf32>
    %31 = arith.subf %28, %30 : vector<4x512xf32>
    %32 = arith.addf %22, %26 : vector<4x512xf32>
    %33 = math.erf %32 : vector<4x512xf32>
    %34 = arith.subf %22, %26 : vector<4x512xf32>
    %35 = math.erf %34 : vector<4x512xf32>
    %36 = arith.subf %33, %35 : vector<4x512xf32>
    %c0_15 = arith.constant 0 : index
    %c0_16 = arith.constant 0 : index
    %37 = vector.load %arg7[%c0_15, %c0_16] : memref<4x512xf32, #tpu.memory_space<vmem>>, vector<4x512xf32>
    %c0_17 = arith.constant 0 : index
    %c0_18 = arith.constant 0 : index
    %38 = vector.load %arg8[%c0_17, %c0_18] : memref<4x512xf32, #tpu.memory_space<vmem>>, vector<4x512xf32>
    %39 = arith.mulf %37, %31 : vector<4x512xf32>
    %40 = arith.mulf %38, %36 : vector<4x512xf32>
    %41 = arith.addf %39, %40 : vector<4x512xf32>
    %cst_19 = arith.constant 5.000000e-01 : f32
    %42 = vector.broadcast %cst_19 : f32 to vector<4x512xf32>
    %43 = arith.mulf %42, %41 : vector<4x512xf32>
    %cst_20 = arith.constant 9.99999997E-7 : f32
    %44 = vector.broadcast %cst_20 : f32 to vector<4x512xf32>
    %45 = arith.maximumf %43, %44 : vector<4x512xf32>
    %46 = math.log %45 : vector<4x512xf32>
    %cst_21 = arith.constant 2.000000e+00 : f32
    %47 = math.log %cst_21 : f32
    %48 = vector.broadcast %47 : f32 to vector<4x512xf32>
    %49 = arith.divf %46, %48 : vector<4x512xf32>
    %cst_22 = arith.constant 0.000000e+00 : f32
    %50 = vector.broadcast %cst_22 : f32 to vector<4x512xf32>
    %51 = arith.subf %50, %49 : vector<4x512xf32>
    %c0_23 = arith.constant 0 : index
    %c0_24 = arith.constant 0 : index
    %52 = vector.load %arg9[%c0_23, %c0_24] : memref<4x512xf32, #tpu.memory_space<vmem>>, vector<4x512xf32>
    tpu.vector_store %arg9[%c0_23, %c0_24], %51 {strides = array<i32>} : memref<4x512xf32, #tpu.memory_space<vmem>>, vector<4x512xf32>,
    return
  }
  func.func @transform_0(%arg0: i32) -> i32 {
    %c0_i32 = arith.constant 0 : i32
    %c0_i32_0 = arith.constant 0 : i32
    return %c0_i32 : i32
  }
  func.func @transform_1(%arg0: i32) -> (i32, i32) {
    %c0_i32 = arith.constant 0 : i32
    %c0_i32_0 = arith.constant 0 : i32
    return %arg0, %c0_i32 : i32, i32
  }
  func.func @transform_2(%arg0: i32) -> (i32, i32) {
    %c0_i32 = arith.constant 0 : i32
    %c0_i32_0 = arith.constant 0 : i32
    return %arg0, %c0_i32 : i32, i32
  }
  func.func @transform_3(%arg0: i32) -> (i32, i32) {
    %c0_i32 = arith.constant 0 : i32
    %c0_i32_0 = arith.constant 0 : i32
    return %arg0, %c0_i32 : i32, i32
  }
  func.func @transform_4(%arg0: i32) -> (i32, i32) {
    %c0_i32 = arith.constant 0 : i32
    %c0_i32_0 = arith.constant 0 : i32
    return %arg0, %c0_i32 : i32, i32
  }
  func.func @transform_5(%arg0: i32) -> (i32, i32) {
    %c0_i32 = arith.constant 0 : i32
    %c0_i32_0 = arith.constant 0 : i32
    return %arg0, %c0_i32 : i32, i32
  }
  func.func @transform_6(%arg0: i32) -> (i32, i32) {
    %c0_i32 = arith.constant 0 : i32
    %c0_i32_0 = arith.constant 0 : i32
    return %arg0, %c0_i32 : i32, i32
  }
  func.func @transform_7(%arg0: i32) -> (i32, i32) {
    %c0_i32 = arith.constant 0 : i32
    %c0_i32_0 = arith.constant 0 : i32
    return %arg0, %c0_i32 : i32, i32
  }
  func.func @transform_8(%arg0: i32) -> (i32, i32) {
    %c0_i32 = arith.constant 0 : i32
    %c0_i32_0 = arith.constant 0 : i32
    return %arg0, %c0_i32 : i32, i32
  }
}

</mosaic_0001>

<bundles_post_ra>
// kernel: tpu_custom_call.1
= control target key start
LH: loop header
LB: loop body
LE: loop exit
PB: predicated region body
PF: predicated region fallthrough
CT: control target
= control target key end

     0   :  { %13 = vsyncpa [#allocation5], 0  ;;  %s585_s0 = inlined_call_operand.hbm [shape: f32[2], index: 0, kind: input, shape index: {}]   ;;  %s586_s1 = inlined_call_operand.hbm [shape: f32[4,512], index: 1, kind: input, shape index: {}]   ;;  %s587_s2 = inlined_call_operand.hbm [shape: f32[4,512], index: 2, kind: input, shape index: {}]   ;;  %s588_s3 = inlined_call_operand.hbm [shape: f32[4,512], index: 3, kind: input, shape index: {}]   ;;  %s589_s4 = inlined_call_operand.hbm [shape: f32[4,512], index: 4, kind: input, shape index: {}]   ;;  %s590_s5 = inlined_call_operand.vmem [shape: f32[4,512], index: 5, kind: input, shape index: {}]   ;;  %s591_s6 = inlined_call_operand.hbm [shape: f32[4,512], index: 6, kind: input, shape index: {}]   ;;  %s592_s7 = inlined_call_operand.hbm [shape: f32[4,512], index: 7, kind: input, shape index: {}]   ;;  %s593_s8 = inlined_call_operand.hbm [shape: f32[4,512], index: 8, kind: output, shape index: {}]  }
   0x1   :  { %14 = vsyncpa [#allocation3], 0 }
   0x2   :  { %15 = vsyncpa [#allocation8], 0 }
   0x3   :  { %16 = vsyncpa [#allocation11], 0 }
   0x4   :  { %17 = vsyncpa [#allocation14], 0 }
   0x5   :  { %18 = vsyncpa [#allocation4], 0  ;;  %s430_s27 = smov [#allocation7]   ;;  %s431_s29 = smov [#allocation10]  }
   0x6   :  { %s43_s28 = sshll.u32 %s430_s27, 4  ;;  %s63_s30 = sshll.u32 %s431_s29, 4  ;;  %s44_s28 = int_to_ptr.vmem [resolvable:$true] %s43_s28  ;;  %s64_s30 = int_to_ptr.vmem [resolvable:$true] %s63_s30 }
   0x7   :  { %s254_s11 = scalar_lea.hbm %s587_s2, 256 }
   0x8   :  { %p255_p0 = scmp.ne.s32.totalorder %s587_s2, %s254_s11  ;;  %p258_p1 = scmp.lt.u32.totalorder %s254_s11, %s587_s2 }
   0xa   :  { %p260_p2 = pnand %p258_p1, %p255_p0 }
   0xc   :  { %263 = shalt.err (!%p260_p2)
}
   0xd   :  { %s264_s16 = scalar_lea.vmem %s44_s28, 256  ;;  %p269_p4 = scmp.lt.s32.totalorder %s44_s28, %s44_s28 }
   0xe   :  { %p265_p3 = scmp.ne.s32.totalorder %s44_s28, %s264_s16  ;;  %p270_p5 = scmp.lt.s32.totalorder %s264_s16, %s264_s16 }
  0x10   :  { %p271_p6 = por %p270_p5, %p269_p4 }
  0x12   :  { %p272_p7 = pnand %p271_p6, %p265_p3 }
  0x14   :  { %275 = shalt.err (!%p272_p7)
}
  0x15   :  { %46 = dma.hbm_to_vmem [thread:$0]  %s587_s2, 256, %s44_s28, [#allocation8]  }
  0x16   :  { %s276_s21 = scalar_lea.hbm %s589_s4, 256 }
  0x17   :  { %p277_p8 = scmp.ne.s32.totalorder %s589_s4, %s276_s21  ;;  %p280_p9 = scmp.lt.u32.totalorder %s276_s21, %s589_s4 }
  0x19   :  { %p282_p10 = pnand %p280_p9, %p277_p8 }
  0x1b   :  { %285 = shalt.err (!%p282_p10)
}
  0x1c   :  { %s286_s26 = scalar_lea.vmem %s64_s30, 256  ;;  %p291_p12 = scmp.lt.s32.totalorder %s64_s30, %s64_s30 }
  0x1d   :  { %p287_p11 = scmp.ne.s32.totalorder %s64_s30, %s286_s26  ;;  %p292_p13 = scmp.lt.s32.totalorder %s286_s26, %s286_s26 }
  0x1f   :  { %p293_p0 = por %p292_p13, %p291_p12 }
  0x21   :  { %p294_p1 = pnand %p293_p0, %p287_p11 }
  0x23   :  { %297 = shalt.err (!%p294_p1)
}
  0x24   :  { %66 = dma.hbm_to_vmem [thread:$0]  %s589_s4, 256, %s64_s30, [#allocation11]  }
  0x25   :  { %s298_s9 = scalar_lea.hbm %s585_s0, 16 }
  0x26   :  { %p299_p2 = scmp.ne.s32.totalorder %s585_s0, %s298_s9  ;;  %p302_p3 = scmp.lt.u32.totalorder %s298_s9, %s585_s0 }
  0x28   :  { %p304_p4 = pnand %p302_p3, %p299_p2 }
  0x2a   :  { %307 = shalt.err (!%p304_p4)
}
  0x2b   :  { %s432_s14 = smov [#allocation2]   ;;  %s433_s4 = smov [#allocation6]  }
  0x2c   :  { %26 = dma.hbm_to_smem %s585_s0, 16, %s432_s14, [#allocation5]  }
  0x2d   :  { %s33_s30 = sshll.u32 %s433_s4, 4  ;;  %s434_s17 = smov [#allocation9]   ;;  %s34_s30 = int_to_ptr.vmem [resolvable:$true] %s33_s30 }
  0x2e   :  { %s53_s18 = sshll.u32 %s434_s17, 4  ;;  %s308_s21 = scalar_lea.hbm %s586_s1, 256  ;;  %s54_s18 = int_to_ptr.vmem [resolvable:$true] %s53_s18 }
  0x2f   :  { %p309_p5 = scmp.ne.s32.totalorder %s586_s1, %s308_s21  ;;  %p312_p6 = scmp.lt.u32.totalorder %s308_s21, %s586_s1 }
  0x31   :  { %p314_p7 = pnand %p312_p6, %p309_p5 }
  0x33   :  { %317 = shalt.err (!%p314_p7)
}
  0x34   :  { %s318_s0 = scalar_lea.vmem %s34_s30, 256  ;;  %p323_p9 = scmp.lt.s32.totalorder %s34_s30, %s34_s30 }
  0x35   :  { %p319_p8 = scmp.ne.s32.totalorder %s34_s30, %s318_s0  ;;  %p324_p10 = scmp.lt.s32.totalorder %s318_s0, %s318_s0 }
  0x37   :  { %p325_p11 = por %p324_p10, %p323_p9 }
  0x39   :  { %p326_p12 = pnand %p325_p11, %p319_p8 }
  0x3b   :  { %329 = shalt.err (!%p326_p12)
}
  0x3c   :  { %36 = dma.hbm_to_vmem [thread:$0]  %s586_s1, 256, %s34_s30, [#allocation3]  }
  0x3d   :  { %s330_s29 = scalar_lea.hbm %s588_s3, 256 }
  0x3e   :  { %p331_p13 = scmp.ne.s32.totalorder %s588_s3, %s330_s29  ;;  %p334_p0 = scmp.lt.u32.totalorder %s330_s29, %s588_s3 }
  0x40   :  { %p336_p1 = pnand %p334_p0, %p331_p13 }
  0x42   :  { %339 = shalt.err (!%p336_p1)
}
  0x43   :  { %s340_s13 = scalar_lea.vmem %s54_s18, 256  ;;  %p345_p3 = scmp.lt.s32.totalorder %s54_s18, %s54_s18 }
  0x44   :  { %p341_p2 = scmp.ne.s32.totalorder %s54_s18, %s340_s13  ;;  %p346_p4 = scmp.lt.s32.totalorder %s340_s13, %s340_s13 }
  0x46   :  { %p347_p5 = por %p346_p4, %p345_p3 }
  0x48   :  { %p348_p6 = pnand %p347_p5, %p341_p2 }
  0x4a   :  { %351 = shalt.err (!%p348_p6)
}
  0x4b   :  { %56 = dma.hbm_to_vmem [thread:$0]  %s588_s3, 256, %s54_s18, [#allocation8]  }
  0x4c   :  { %s435_s15 = smov [#allocation12]   ;;  %s436_s4 = smov [#allocation13]  }
  0x4d   :  { %s75_s16 = sshll.u32 %s435_s15, 4  ;;  %s85_s30 = sshll.u32 %s436_s4, 4  ;;  %s76_s16 = int_to_ptr.vmem [resolvable:$true] %s75_s16  ;;  %s86_s30 = int_to_ptr.vmem [resolvable:$true] %s85_s30 }
  0x4e   :  { %s352_s20 = scalar_lea.hbm %s591_s6, 256 }
  0x4f   :  { %p353_p7 = scmp.ne.s32.totalorder %s591_s6, %s352_s20  ;;  %p356_p8 = scmp.lt.u32.totalorder %s352_s20, %s591_s6 }
  0x51   :  { %p358_p9 = pnand %p356_p8, %p353_p7 }
  0x53   :  { %361 = shalt.err (!%p358_p9)
}
  0x54   :  { %s362_s3 = scalar_lea.vmem %s76_s16, 256  ;;  %p367_p11 = scmp.lt.s32.totalorder %s76_s16, %s76_s16 }
  0x55   :  { %p363_p10 = scmp.ne.s32.totalorder %s76_s16, %s362_s3  ;;  %p368_p12 = scmp.lt.s32.totalorder %s362_s3, %s362_s3 }
  0x57   :  { %p369_p13 = por %p368_p12, %p367_p11 }
  0x59   :  { %p370_p0 = pnand %p369_p13, %p363_p10 }
  0x5b   :  { %373 = shalt.err (!%p370_p0)
}
  0x5c   :  { %78 = dma.hbm_to_vmem [thread:$0]  %s591_s6, 256, %s76_s16, [#allocation11]  }
  0x5d   :  { %s374_s2 = scalar_lea.hbm %s592_s7, 256 }
  0x5e   :  { %p375_p1 = scmp.ne.s32.totalorder %s592_s7, %s374_s2  ;;  %p378_p2 = scmp.lt.u32.totalorder %s374_s2, %s592_s7 }
  0x60   :  { %p380_p3 = pnand %p378_p2, %p375_p1 }
  0x62   :  { %383 = shalt.err (!%p380_p3)
}
  0x63   :  { %s384_s10 = scalar_lea.vmem %s86_s30, 256  ;;  %p389_p5 = scmp.lt.s32.totalorder %s86_s30, %s86_s30 }
  0x64   :  { %p385_p4 = scmp.ne.s32.totalorder %s86_s30, %s384_s10  ;;  %p390_p6 = scmp.lt.s32.totalorder %s384_s10, %s384_s10 }
  0x66   :  { %p391_p7 = por %p390_p6, %p389_p5 }
  0x68   :  { %p392_p8 = pnand %p391_p7, %p385_p4 }
  0x6a   :  { %395 = shalt.err (!%p392_p8)
}
  0x6b   :  { %88 = dma.hbm_to_vmem [thread:$0]  %s592_s7, 256, %s86_s30, [#allocation14]  }
  0x6c   :  { %418 = dma.done.wait [#allocation5], 16  }
  0x6d   :  { %419 = vsyncadd [#allocation5], 4294967280 }
  0x6e   :  { %420 = dma.done.wait [#allocation3], 256  }
  0x6f   :  { %421 = vsyncadd [#allocation3], 4294967040 }
  0x70   :  { %422 = dma.done.wait [#allocation8], 512  }
  0x71   :  { %423 = vsyncadd [#allocation8], 4294966784 }
  0x72   :  { %424 = dma.done.wait [#allocation11], 512  }
  0x73   :  { %425 = vsyncadd [#allocation11], 4294966784 }
  0x74   :  { %426 = dma.done.wait [#allocation14], 256  }
  0x75   :  { %427 = vsyncadd [#allocation14], 4294967040 }
  0x76   :  { %110 = sfence }
  0x77   :  { %s113_s12 = sld [smem:[#allocation2]]  ;;  %s217_s13 = sld [smem:[#allocation2 + $0x1]]  ;;  %v121_v0 = vld [vmem:[#allocation10] sm:$0xff]  ;;  %v122_v4 = vld [vmem:[#allocation10 + $0x8] sm:$0xff]  ;;  %v111_v6 = vld [vmem:[#allocation6] sm:$0xff] }
  0x78   :  { %v123_v1 = vmax.f32 %v121_v0, 1e-09  ;;  %v125_v2 = vld [vmem:[%s590_s5] sm:$0xff]  ;;  %v126_v5 = vld [vmem:[%s590_s5 + $0x8] sm:$0xff]  ;;  %v112_v7 = vld [vmem:[#allocation6 + $0x8] sm:$0xff]  ;;  %s437_s5 = smov [#allocation15]  }
  0x79   :  { %v127_v3 = vmax.f32 %v125_v2, 1e-09  ;;  %v124_v8 = vmax.f32 %v122_v4, 1e-09  ;;  %v128_v9 = vmax.f32 %v126_v5, 1e-09 }
  0x7a   :  { %226 = vrcp.f32 %v123_v1  ;;  %v137_v15 = vld [vmem:[#allocation7] sm:$0xff]  ;;  %v143_v16 = vld [vmem:[#allocation9] sm:$0xff]  ;;  %v138_v19 = vld [vmem:[#allocation7 + $0x8] sm:$0xff]  ;;  %s204_s16 = sshll.u32 %s437_s5, 4  ;;  %s205_s16 = int_to_ptr.vmem [resolvable:$true] %s204_s16 }
  0x7b   :  { %228 = vrcp.f32 %v127_v3  ;;  %v144_v22 = vld [vmem:[#allocation9 + $0x8] sm:$0xff]  ;;  %v173_v50 = vld [vmem:[#allocation12] sm:$0xff]  ;;  %v175_v54 = vld [vmem:[#allocation13] sm:$0xff]  ;;  %s396_s4 = scalar_lea.vmem %s205_s16, 256  ;;  %p401_p10 = scmp.lt.s32.totalorder %s205_s16, %s205_s16 }
  0x7c   :  { %230 = vrcp.f32 %v124_v8  ;;  %v174_v59 = vld [vmem:[#allocation12 + $0x8] sm:$0xff]  ;;  %v176_v0 = vld [vmem:[#allocation13 + $0x8] sm:$0xff]  ;;  %p397_p9 = scmp.ne.s32.totalorder %s205_s16, %s396_s4  ;;  %p402_p11 = scmp.lt.s32.totalorder %s396_s4, %s396_s4 }
  0x7d   :  { %v115_v10 = vstv %s113_s12  ;;  %v118_v11 = vstv %s217_s13  ;;  %232 = vrcp.f32 %v128_v9 }
  0x7e   :  { %v116_v12 = vmax.f32 %v115_v10, %v111_v6  ;;  %v117_v13 = vmax.f32 %v115_v10, %v112_v7  ;;  %p403_p12 = por %p402_p11, %p401_p10 }
  0x80   :  { %v119_v14 = vmin.f32 %v118_v11, %v116_v12  ;;  %v120_v17 = vmin.f32 %v118_v11, %v117_v13  ;;  %p404_p13 = pnand %p403_p12, %p397_p9 }
  0x82   :  { %v139_v18 = vsub.f32 %v119_v14, %v137_v15  ;;  %v145_v21 = vsub.f32 %v119_v14, %v143_v16  ;;  %v140_v26 = vsub.f32 %v120_v17, %v138_v19  ;;  %v146_v30 = vsub.f32 %v120_v17, %v144_v22 }
  0x84   :  { %v227_v20 = vpop.eup %226 }
  0x85   :  { %v229_v23 = vpop.eup %228  ;;  %v130_v24 = vmul.f32 0.70710677, %v227_v20 }
  0x86   :  { %v134_v25 = vmul.f32 0.70710677, %v229_v23  ;;  %v231_v27 = vpop.eup %230 }
  0x87   :  { %v141_v28 = vmul.f32 %v139_v18, %v130_v24  ;;  %v149_v29 = vmul.f32 0.5, %v130_v24  ;;  %v233_v31 = vpop.eup %232  ;;  %v132_v34 = vmul.f32 0.70710677, %v231_v27 }
  0x88   :  { %v147_v32 = vmul.f32 %v145_v21, %v134_v25  ;;  %v151_v33 = vmul.f32 0.5, %v134_v25  ;;  %v136_v37 = vmul.f32 0.70710677, %v233_v31 }
  0x89   :  { %v153_v35 = vadd.f32 %v149_v29, %v141_v28  ;;  %v157_v36 = vsub.f32 %v141_v28, %v149_v29  ;;  %v142_v40 = vmul.f32 %v140_v26, %v132_v34  ;;  %v150_v41 = vmul.f32 0.5, %v132_v34 }
  0x8a   :  { %v163_v38 = vadd.f32 %v151_v33, %v147_v32  ;;  %v167_v39 = vsub.f32 %v147_v32, %v151_v33  ;;  %v148_v42 = vmul.f32 %v146_v30, %v136_v37  ;;  %v152_v43 = vmul.f32 0.5, %v136_v37 }
  0x8b   :  { %234 = verf.f32 %v153_v35  ;;  %v154_v44 = vadd.f32 %v150_v41, %v142_v40  ;;  %v158_v45 = vsub.f32 %v142_v40, %v150_v41 }
  0x8c   :  { %236 = verf.f32 %v157_v36  ;;  %v164_v46 = vadd.f32 %v152_v43, %v148_v42  ;;  %v168_v47 = vsub.f32 %v148_v42, %v152_v43 }
  0x8d   :  { %238 = verf.f32 %v163_v38 }
  0x8e   :  { %240 = verf.f32 %v167_v39 }
  0x8f   :  { %242 = verf.f32 %v154_v44 }
  0x90   :  { %244 = verf.f32 %v158_v45 }
  0x91   :  { %246 = verf.f32 %v164_v46 }
  0x92   :  { %248 = verf.f32 %v168_v47 }
  0x95   :  { %v235_v48 = vpop.eup %234 }
  0x96   :  { %v237_v49 = vpop.eup %236 }
  0x97   :  { %v239_v51 = vpop.eup %238  ;;  %v161_v52 = vsub.f32 %v235_v48, %v237_v49 }
  0x98   :  { %v241_v53 = vpop.eup %240 }
  0x99   :  { %v243_v55 = vpop.eup %242  ;;  %v171_v56 = vsub.f32 %v239_v51, %v241_v53  ;;  %v177_v57 = vmul.f32 %v173_v50, %v161_v52 }
  0x9a   :  { %v245_v58 = vpop.eup %244 }
  0x9b   :  { %v247_v60 = vpop.eup %246  ;;  %v179_v61 = vmul.f32 %v175_v54, %v171_v56  ;;  %v162_v62 = vsub.f32 %v243_v55, %v245_v58 }
  0x9c   :  { %v249_v63 = vpop.eup %248 }
  0x9d   :  { %v181_v1 = vadd.f32 %v179_v61, %v177_v57  ;;  %v172_v2 = vsub.f32 %v247_v60, %v249_v63  ;;  %v178_v3 = vmul.f32 %v174_v59, %v162_v62 }
  0x9f   :  { %v183_v4 = vmul.f32 0.5, %v181_v1  ;;  %v180_v5 = vmul.f32 %v176_v0, %v172_v2 }
  0xa1   :  { %v185_v6 = vmax.f32 %v183_v4, 1e-06  ;;  %v182_v7 = vadd.f32 %v180_v5, %v178_v3 }
  0xa3   :  { %250 = vlog2.f32 %v185_v6  ;;  %v184_v8 = vmul.f32 0.5, %v182_v7 }
  0xa5   :  { %v186_v9 = vmax.f32 %v184_v8, 1e-06 }
  0xa7   :  { %252 = vlog2.f32 %v186_v9 }
  0xad   :  { %v251_v10 = vpop.eup %250 }
  0xae   :  { %v188_v11 = vmul.f32 0.6931472, %v251_v10 }
  0xb0   :  { %v192_v12 = vmul.f32 1.442695, %v188_v11 }
  0xb1   :  { %v253_v13 = vpop.eup %252 }
  0xb2   :  { %v194_v14 = vsub.f32 0.0, %v192_v12  ;;  %v190_v15 = vmul.f32 0.6931472, %v253_v13 }
  0xb4   :  { %196 = vst [vmem:[#allocation15] sm:$0xff] %v194_v14  ;;  %v193_v16 = vmul.f32 1.442695, %v190_v15 }
  0xb6   :  { %v195_v17 = vsub.f32 0.0, %v193_v16 }
  0xb8   :  { %197 = vst [vmem:[#allocation15 + $0x8] sm:$0xff] %v195_v17 }
  0xb9   :  { %407 = shalt.err (!%p404_p13)
}
  0xba   :  { %s408_s19 = scalar_lea.hbm %s593_s8, 256 }
  0xbb   :  { %p409_p0 = scmp.ne.s32.totalorder %s593_s8, %s408_s19  ;;  %p412_p1 = scmp.lt.u32.totalorder %s408_s19, %s593_s8 }
  0xbd   :  { %p414_p2 = pnand %p412_p1, %p409_p0 }
  0xbf   :  { %417 = shalt.err (!%p414_p2)
}
  0xc0   :  { %207 = dma.vmem_to_hbm [thread:$0]  %s205_s16, 256, %s593_s8, [#allocation4]  }
  0xc1   :  { %428 = dma.done.wait [#allocation4], 256  }
  0xc2   :  { %429 = vsyncadd [#allocation4], 4294967040 }
  0xc3   :  { %211 = vsyncpa [#allocation3], 1 }
  0xc4   :  { %212 = vsyncpa [#allocation8], 1 }
  0xc5   :  { %213 = vsyncpa [#allocation11], 1 }
  0xc6   :  { %214 = vsyncpa [#allocation14], 1 }
  0xc7   :  { %215 = vsyncpa [#allocation4], 1 }
  0xc8   :  { %216 = vsyncpa [#allocation5], 1 }

</bundles_post_ra>
